<compile_context>
chip_gen: v6e
topology: v6e:2x2x1
jax: 0.10.0
libtpu: 0.0.40
codegen_flags: <defaults>
</compile_context>

<pallas_src>
import functools
import math

import jax
import jax.numpy as jnp
from jax import lax
from jax.experimental import pallas as pl
from jax.experimental.pallas import tpu as pltpu


_MASK_VALUE = -1000000.0  # identical to the PyTorch sequence_mask fill value


# ---------------------------------------------------------------------------
# Kernels
# ---------------------------------------------------------------------------
def _flash_attn_kernel(*args, scale, block_k, masked, compute_dtype):
    """Online-softmax attention. One grid step = (batch tile, Q tile, K tile).

    masked=True arg order:
      maxvl_ref (SMEM, (B//TB,)), vl_ref (TB,TQ,1) i32, q (TB,TQ,D),
      k (TB,TK,D), v (TB,TK,Dv), o (TB,TQ,Dv), m/l (TB,TQ,1) f32, acc (TB,TQ,Dv) f32
    masked=False: same without maxvl_ref / vl_ref.
    """
    if masked:
        (maxvl_ref, vl_ref, q_ref, k_ref, v_ref, o_ref,
         m_sc, l_sc, acc_sc) = args
    else:
        q_ref, k_ref, v_ref, o_ref, m_sc, l_sc, acc_sc = args

    ki = pl.program_id(2)

    @pl.when(ki == 0)
    def _():
        m_sc[...] = jnp.full(m_sc.shape, -jnp.inf, jnp.float32)
        l_sc[...] = jnp.zeros(l_sc.shape, jnp.float32)
        acc_sc[...] = jnp.zeros(acc_sc.shape, jnp.float32)

    def compute():
        q = q_ref[...] * scale              # scale folded into (TB,TQ,D) tile
        k = k_ref[...]
        v = v_ref[...]
        if compute_dtype is not None:       # opt-in lower-precision MXU feed
            q = q.astype(compute_dtype)
            k = k.astype(compute_dtype)
            v = v.astype(compute_dtype)

        # scores: contraction over shared last dim -> no explicit k transpose
        s = jnp.einsum("bqd,bkd->bqk", q, k,
                       preferred_element_type=jnp.float32)       # (TB,TQ,TK)

        if masked:
            # local iota (no per-step full-tile add); shift the tiny vl instead
            vl_rem = vl_ref[...] - ki * block_k                  # (TB,TQ,1)
            col = lax.broadcasted_iota(jnp.int32, s.shape, 2)
            s = jnp.where(col < vl_rem, s, jnp.float32(_MASK_VALUE))

        m_prev = m_sc[...]
        m_new = jnp.maximum(m_prev, jnp.max(s, axis=-1, keepdims=True))
        alpha = jnp.exp(m_prev - m_new)
        p = jnp.exp(s - m_new)
        l_sc[...] = alpha * l_sc[...] + jnp.sum(p, axis=-1, keepdims=True)
        acc_sc[...] = alpha * acc_sc[...] + jnp.einsum(
            "bqk,bkd->bqd", p.astype(v.dtype), v,
            preferred_element_type=jnp.float32)
        m_sc[...] = m_new

    if masked:
        # Skip K tiles that are entirely past every row's valid length in this
        # batch tile (exact: masked contributions underflow to 0 in f32).
        max_vl = maxvl_ref[pl.program_id(0)]
        pl.when(ki * block_k < max_vl)(compute)
    else:
        compute()

    @pl.when(ki == pl.num_programs(2) - 1)
    def _():
        inv = 1.0 / l_sc[...]               # small (TB,TQ,1) reciprocal
        o_ref[...] = (acc_sc[...] * inv).astype(o_ref.dtype)


def _attn_weights_kernel(vl_ref, q_ref, k_ref, v_ref, o_ref, w_ref, *, scale):
    """Compatibility path that also materializes the attention weights
    (what the PyTorch module stores as self.attention_weights)."""
    q = q_ref[...] * scale                  # (TB, TQ, D)
    k = k_ref[...]                          # (TB, K, D)
    v = v_ref[...]                          # (TB, K, Dv)
    vl = vl_ref[...]                        # (TB, TQ, 1) int32

    s = jnp.einsum("bqd,bkd->bqk", q, k,
                   preferred_element_type=jnp.float32)           # (TB,TQ,K)
    col = lax.broadcasted_iota(jnp.int32, s.shape, 2)
    s = jnp.where(col < vl, s, jnp.float32(_MASK_VALUE))

    m = jnp.max(s, axis=-1, keepdims=True)
    e = jnp.exp(s - m)
    w = e * (1.0 / jnp.sum(e, axis=-1, keepdims=True))

    w_ref[...] = w.astype(w_ref.dtype)
    o_ref[...] = jnp.einsum("bqk,bkd->bqd", w.astype(v.dtype), v,
                            preferred_element_type=jnp.float32).astype(o_ref.dtype)


# ---------------------------------------------------------------------------
# Tile selection helpers
# ---------------------------------------------------------------------------
def _pick_tile(n, limit, preferred_multiple=128, required_multiple=8):
    """Largest divisor of n <= limit that is a multiple of preferred_multiple;
    else a multiple of required_multiple; else n (full extent is always legal)."""
    if n <= limit:
        return n
    fallback = None
    for t in range(limit, 0, -1):
        if n % t:
            continue
        if t % preferred_multiple == 0:
            return t
        if fallback is None and t % required_multiple == 0:
            fallback = t
    return fallback if fallback is not None else n


def _pick_divisor(n, limit):
    if n <= limit:
        return n
    for t in range(limit, 0, -1):
        if n % t == 0:
            return t
    return 1


def _prepare_valid_lens(valid_lens, B, Q, K):
    if valid_lens is None:
        vl = jnp.full((B, Q), K, dtype=jnp.int32)
    elif valid_lens.ndim == 1:
        # torch.repeat_interleave(valid_lens, Q): same length for every query row
        vl = jnp.broadcast_to(valid_lens.astype(jnp.int32)[:, None], (B, Q))
    else:
        vl = valid_lens.astype(jnp.int32).reshape(B, Q)
    return vl.reshape(B, Q, 1)              # broadcasts over the K lane dim


# ---------------------------------------------------------------------------
# Wrapper
# ---------------------------------------------------------------------------
def dot_product_attention(queries, keys, values, valid_lens=None, *,
                          return_weights=False, mxu_dtype=None,
                          block_b=None, block_q=None, block_k=None):
    """Pallas-backed equivalent of DotProductAttention.forward (eval mode).

    Returns `output` (B, Q, Dv); with return_weights=True also returns the
    (B, Q, K) attention weights the PyTorch module stores.
    mxu_dtype: optional lower-precision dtype (e.g. jnp.bfloat16) used only to
    feed the two MXU matmuls (f32 accumulation kept); loosens accuracy."""
    B, Q, D = queries.shape
    _, K, Dv = values.shape
    scale = 1.0 / math.sqrt(D)
    # TODO(synk): if D/Dv < 128 the last dim is lane-padded; callers with many
    # heads should fuse heads into the last dim before calling this kernel.

    # Tile sizes respecting (8,128) layouts; tk prefers 128-multiples (MXU N).
    tq = block_q if block_q is not None else _pick_tile(Q, 512, 128, 8)
    tk = block_k if block_k is not None else _pick_tile(K, 256, 128, 8)
    slab_limit = 128 * 1024                 # bound tb*tq*tk f32 score slab
    tb = block_b if block_b is not None else _pick_divisor(
        B, max(1, slab_limit // max(1, tq * tk)))

    # v7x dual-TensorCore: expose >= 2 steps on the parallel grid axes.
    if block_b is None and block_q is None and (B // tb) * (Q // tq) == 1:
        if B > 1:
            tb = _pick_divisor(B, max(1, B // 2))
        elif Q % 16 == 0 and tq > 8:
            tq = Q // 2

    assert B % tb == 0, f"block_b={tb} must divide B={B}"
    assert Q % tq == 0, f"block_q={tq} must divide Q={Q}"
    assert K % tk == 0, f"block_k={tk} must divide K={K}"

    itemsize = jnp.dtype(queries.dtype).itemsize
    masked = valid_lens is not None

    if return_weights:
        # TODO(synk): this path keeps full-K k/v blocks and a (tb,tq,K) weights
        # tile resident (not K-tiled); only use it when weights are needed and
        # K is moderate (VMEM-bound on v7x for large K).
        vl = _prepare_valid_lens(valid_lens, B, Q, K)
        blk_w = (tb * tq * D + tb * K * D + tb * K * Dv + tb * tq * Dv
                 + tb * tq * K) * itemsize + tb * tq * 128 * 4
        vmem_limit_w = int(min(48 * 2**20,
                               max(2 * blk_w + 6 * tb * tq * K * 4, 16 * 2**20)))
        out, w = pl.pallas_call(
            functools.partial(_attn_weights_kernel, scale=scale),
            out_shape=(
                jax.ShapeDtypeStruct((B, Q, Dv), queries.dtype),
                jax.ShapeDtypeStruct((B, Q, K), queries.dtype),
            ),
            grid_spec=pltpu.PrefetchScalarGridSpec(
                num_scalar_prefetch=0,
                grid=(B // tb, Q // tq),
                in_specs=[
                    pl.BlockSpec((tb, tq, 1), lambda b, qi: (b, qi, 0)),
                    pl.BlockSpec((tb, tq, D), lambda b, qi: (b, qi, 0)),
                    pl.BlockSpec((tb, K, D), lambda b, qi: (b, 0, 0)),
                    pl.BlockSpec((tb, K, Dv), lambda b, qi: (b, 0, 0)),
                ],
                out_specs=[
                    pl.BlockSpec((tb, tq, Dv), lambda b, qi: (b, qi, 0)),
                    pl.BlockSpec((tb, tq, K), lambda b, qi: (b, qi, 0)),
                ],
            ),
            compiler_params=pltpu.CompilerParams(
                dimension_semantics=("parallel", "parallel"),
                vmem_limit_bytes=vmem_limit_w),
        )(vl, queries, keys, values)
        return out, w

    # --- flash path ---------------------------------------------------------
    blk = (tb * tq * D + tb * tk * D + tb * tk * Dv + tb * tq * Dv) * itemsize \
        + (tb * tq * 128 * 4 if masked else 0)
    scratch_bytes = tb * tq * (Dv + 2) * 4
    temps = 6 * tb * tq * tk * 4
    vmem_limit = int(min(48 * 2**20, max(2 * blk + scratch_bytes + temps,
                                         16 * 2**20)))

    kernel = functools.partial(_flash_attn_kernel, scale=scale, block_k=tk,
                               masked=masked, compute_dtype=mxu_dtype)
    out_shape = jax.ShapeDtypeStruct((B, Q, Dv), queries.dtype)
    scratch_shapes = [
        pltpu.VMEM((tb, tq, 1), jnp.float32),   # m (running max)
        pltpu.VMEM((tb, tq, 1), jnp.float32),   # l (running denom)
        pltpu.VMEM((tb, tq, Dv), jnp.float32),  # acc
    ]
    compiler_params = pltpu.CompilerParams(
        dimension_semantics=("parallel", "parallel", "arbitrary"),
        vmem_limit_bytes=vmem_limit)

    if masked:
        vl = _prepare_valid_lens(valid_lens, B, Q, K)
        # Per-batch-tile max valid length -> skip fully-masked K tiles.
        # TODO(synk): rows with valid_len == 0 are degenerate (PyTorch yields a
        # uniform softmax over -1e6 scores); we clamp the skip bound to 1.
        maxvl = jnp.maximum(vl.reshape(B // tb, tb * Q).max(axis=1), 1)
        maxvl = maxvl.astype(jnp.int32)
        out = pl.pallas_call(
            kernel,
            out_shape=out_shape,
            grid_spec=pltpu.PrefetchScalarGridSpec(
                num_scalar_prefetch=1,
                grid=(B // tb, Q // tq, K // tk),
                in_specs=[
                    pl.BlockSpec((tb, tq, 1), lambda b, qi, ki, mv: (b, qi, 0)),
                    pl.BlockSpec((tb, tq, D), lambda b, qi, ki, mv: (b, qi, 0)),
                    pl.BlockSpec((tb, tk, D), lambda b, qi, ki, mv: (b, ki, 0)),
                    pl.BlockSpec((tb, tk, Dv), lambda b, qi, ki, mv: (b, ki, 0)),
                ],
                out_specs=pl.BlockSpec((tb, tq, Dv),
                                       lambda b, qi, ki, mv: (b, qi, 0)),
                scratch_shapes=scratch_shapes,
            ),
            compiler_params=compiler_params,
        )(maxvl, vl, queries, keys, values)
        return out

    # Unmasked fast path: no vl input, no iota/compare/select in the kernel.
    out = pl.pallas_call(
        kernel,
        out_shape=out_shape,
        grid_spec=pltpu.PrefetchScalarGridSpec(
            num_scalar_prefetch=0,
            grid=(B // tb, Q // tq, K // tk),
            in_specs=[
                pl.BlockSpec((tb, tq, D), lambda b, qi, ki: (b, qi, 0)),
                pl.BlockSpec((tb, tk, D), lambda b, qi, ki: (b, ki, 0)),
                pl.BlockSpec((tb, tk, Dv), lambda b, qi, ki: (b, ki, 0)),
            ],
            out_specs=pl.BlockSpec((tb, tq, Dv), lambda b, qi, ki: (b, qi, 0)),
            scratch_shapes=scratch_shapes,
        ),
        compiler_params=compiler_params,
    )(queries, keys, values)
    return out


# ---------------------------------------------------------------------------
# Pure-JAX reference mirroring the PyTorch semantics
# ---------------------------------------------------------------------------
def _reference(queries, keys, values, valid_lens):
    d = queries.shape[-1]
    scores = jnp.einsum("bqd,bkd->bqk", queries, keys) / math.sqrt(d)
    if valid_lens is not None:
        vl = valid_lens[:, None] if valid_lens.ndim == 1 else valid_lens
        col = jnp.arange(scores.shape[-1])[None, None, :]
        scores = jnp.where(col < vl[..., None], scores, _MASK_VALUE)
    w = jax.nn.softmax(scores, axis=-1)
    return jnp.einsum("bqk,bkv->bqv", w, values), w


if __name__ == "__main__":
    # Small shapes consistent with the module's bmm-based forward.
    B, Q, K, D, Dv = 2, 8, 16, 32, 32
    key = jax.random.PRNGKey(0)
    kq, kk, kv = jax.random.split(key, 3)
    queries = jax.random.normal(kq, (B, Q, D), dtype=jnp.float32)
    keys = jax.random.normal(kk, (B, K, D), dtype=jnp.float32)
    values = jax.random.normal(kv, (B, K, Dv), dtype=jnp.float32)
    valid_lens = jnp.array([3, 11], dtype=jnp.int32)     # 1-D (per-batch) case

    ref_out, ref_w = _reference(queries, keys, values, valid_lens)

    # Fast path: force two K tiles so the online-softmax accumulation across
    # the "arbitrary" axis and the masked-tile skip are both exercised.
    out = dot_product_attention(queries, keys, values, valid_lens, block_k=8)
    jax.block_until_ready(out)
    assert jnp.allclose(out, ref_out, atol=1e-5, rtol=1e-4), "flash output mismatch"

    # Compatibility path: also returns the attention weights the module stores.
    out_w, attn_w = dot_product_attention(queries, keys, values, valid_lens,
                                          return_weights=True)
    jax.block_until_ready(out_w)
    jax.block_until_ready(attn_w)
    assert jnp.allclose(out_w, ref_out, atol=1e-5, rtol=1e-4), "weights-path output mismatch"
    assert jnp.allclose(attn_w, ref_w, atol=1e-5, rtol=1e-4), "attention weights mismatch"

    # 2-D valid_lens (per-query-row lengths).
    vl2d = jnp.stack([jnp.arange(1, Q + 1),
                      jnp.full((Q,), 7)], axis=0).astype(jnp.int32)
    out2 = dot_product_attention(queries, keys, values, vl2d, block_k=8)
    jax.block_until_ready(out2)
    ref2, _ = _reference(queries, keys, values, vl2d)
    assert jnp.allclose(out2, ref2, atol=1e-5, rtol=1e-4), "2-D valid_lens mismatch"

    # valid_lens=None: exercises the unmasked fast path (no mask ops at all).
    out3 = dot_product_attention(queries, keys, values, None, block_k=8)
    jax.block_until_ready(out3)
    ref3, _ = _reference(queries, keys, values, None)
    assert jnp.allclose(out3, ref3, atol=1e-5, rtol=1e-4), "unmasked mismatch"

    # TODO(synk): nn.Dropout is identity at inference; dropout RNG is not applied.
    print("KERNEL_OK")
</pallas_src>

<mosaic_0001>
module attributes {stable_mosaic.version = 11 : i64} {
  func.func @_flash_attn_kernel(%arg0: i32, %arg1: i32, %arg2: i32, %arg3: memref<2xi32, #tpu.memory_space<smem>>, %arg4: memref<1x8x1xi32, #tpu.memory_space<vmem>>, %arg5: memref<1x8x32xf32, #tpu.memory_space<vmem>>, %arg6: memref<1x8x32xf32, #tpu.memory_space<vmem>>, %arg7: memref<1x8x32xf32, #tpu.memory_space<vmem>>, %arg8: memref<1x8x32xf32, #tpu.memory_space<vmem>>, %arg9: memref<1x8x1xf32, #tpu.memory_space<vmem>>, %arg10: memref<1x8x1xf32, #tpu.memory_space<vmem>>, %arg11: memref<1x8x32xf32, #tpu.memory_space<vmem>>) attributes {dimension_semantics = [#tpu.dimension_semantics<parallel>, #tpu.dimension_semantics<parallel>, #tpu.dimension_semantics<arbitrary>], iteration_bounds = array<i64: 2, 1, 2>, scalar_prefetch = 1 : i64, scratch_operands = 3 : i64, tpu.core_type = #tpu.core_type<tc>, window_params = [{transform_indices = @transform_0, window_bounds = array<i64: 1, 8, 1>}, {transform_indices = @transform_1, window_bounds = array<i64: 1, 8, 32>}, {transform_indices = @transform_2, window_bounds = array<i64: 1, 8, 32>}, {transform_indices = @transform_3, window_bounds = array<i64: 1, 8, 32>}, {transform_indices = @transform_4, window_bounds = array<i64: 1, 8, 32>}]} {
    %c0_i32 = arith.constant 0 : i32
    %0 = arith.cmpi eq, %arg2, %c0_i32 : i32
    %1 = arith.extui %0 : i1 to i32
    %c0_i32_0 = arith.constant 0 : i32
    %2 = arith.cmpi ne, %1, %c0_i32_0 : i32
    scf.if %2 {
      %cst = arith.constant 0xFF800000 : f32
      %12 = vector.broadcast %cst : f32 to vector<1x8x1xf32>
      %c0 = arith.constant 0 : index
      %c0_3 = arith.constant 0 : index
      %c0_4 = arith.constant 0 : index
      %13 = vector.load %arg9[%c0, %c0_3, %c0_4] : memref<1x8x1xf32, #tpu.memory_space<vmem>>, vector<1x8x1xf32>
      tpu.vector_store %arg9[%c0, %c0_3, %c0_4], %12 {strides = array<i32>} : memref<1x8x1xf32, #tpu.memory_space<vmem>>, vector<1x8x1xf32>,
      %cst_5 = arith.constant 0.000000e+00 : f32
      %14 = vector.broadcast %cst_5 : f32 to vector<1x8x1xf32>
      %c0_6 = arith.constant 0 : index
      %c0_7 = arith.constant 0 : index
      %c0_8 = arith.constant 0 : index
      %15 = vector.load %arg10[%c0_6, %c0_7, %c0_8] : memref<1x8x1xf32, #tpu.memory_space<vmem>>, vector<1x8x1xf32>
      tpu.vector_store %arg10[%c0_6, %c0_7, %c0_8], %14 {strides = array<i32>} : memref<1x8x1xf32, #tpu.memory_space<vmem>>, vector<1x8x1xf32>,
      %cst_9 = arith.constant 0.000000e+00 : f32
      %16 = vector.broadcast %cst_9 : f32 to vector<1x8x32xf32>
      %c0_10 = arith.constant 0 : index
      %c0_11 = arith.constant 0 : index
      %c0_12 = arith.constant 0 : index
      %17 = vector.load %arg11[%c0_10, %c0_11, %c0_12] : memref<1x8x32xf32, #tpu.memory_space<vmem>>, vector<1x8x32xf32>
      tpu.vector_store %arg11[%c0_10, %c0_11, %c0_12], %16 {strides = array<i32>} : memref<1x8x32xf32, #tpu.memory_space<vmem>>, vector<1x8x32xf32>,
    } else {
    }
    %3 = arith.index_cast %arg0 : i32 to index
    %4 = memref.load %arg3[%3] : memref<2xi32, #tpu.memory_space<smem>>
    %c8_i32 = arith.constant 8 : i32
    %5 = arith.muli %arg2, %c8_i32 : i32
    %6 = arith.cmpi slt, %5, %4 : i32
    %7 = arith.extui %6 : i1 to i32
    %c0_i32_1 = arith.constant 0 : i32
    %8 = arith.cmpi ne, %7, %c0_i32_1 : i32
    scf.if %8 {
      %c0 = arith.constant 0 : index
      %c0_3 = arith.constant 0 : index
      %c0_4 = arith.constant 0 : index
      %12 = vector.load %arg5[%c0, %c0_3, %c0_4] : memref<1x8x32xf32, #tpu.memory_space<vmem>>, vector<1x8x32xf32>
      %cst = arith.constant 0.176776692 : f32
      %13 = vector.broadcast %cst : f32 to vector<1x8x32xf32>
      %14 = arith.mulf %12, %13 : vector<1x8x32xf32>
      %c0_5 = arith.constant 0 : index
      %c0_6 = arith.constant 0 : index
      %c0_7 = arith.constant 0 : index
      %15 = vector.load %arg6[%c0_5, %c0_6, %c0_7] : memref<1x8x32xf32, #tpu.memory_space<vmem>>, vector<1x8x32xf32>
      %c0_8 = arith.constant 0 : index
      %c0_9 = arith.constant 0 : index
      %c0_10 = arith.constant 0 : index
      %16 = vector.load %arg7[%c0_8, %c0_9, %c0_10] : memref<1x8x32xf32, #tpu.memory_space<vmem>>, vector<1x8x32xf32>
      "tpu.trace_start"() <{level = 10 : i32, message = "bqd,bkd->bqk"}> : () -> ()
      %cst_11 = arith.constant dense<0.000000e+00> : vector<1x8x8xf32>
      %17 = tpu.matmul %14, %15, %cst_11 {dimension_numbers = #tpu.dot_dimension_numbers<[2], [2], [1], [1], [0, 0, 0, 1, 1, 1], [0], [0]>} : vector<1x8x32xf32>, vector<1x8x32xf32>, vector<1x8x8xf32> -> vector<1x8x8xf32>
      "tpu.trace_stop"() : () -> ()
      %c0_12 = arith.constant 0 : index
      %c0_13 = arith.constant 0 : index
      %c0_14 = arith.constant 0 : index
      %18 = vector.load %arg4[%c0_12, %c0_13, %c0_14] : memref<1x8x1xi32, #tpu.memory_space<vmem>>, vector<1x8x1xi32>
      %c8_i32_15 = arith.constant 8 : i32
      %19 = arith.muli %arg2, %c8_i32_15 : i32
      %20 = vector.broadcast %19 : i32 to vector<1x8x1xi32>
      %21 = arith.subi %18, %20 : vector<1x8x1xi32>
      %22 = tpu.iota {dimensions = array<i32: 2>} : vector<1x8x8xi32>
      %23 = vector.broadcast %21 : vector<1x8x1xi32> to vector<1x8x8xi32>
      %24 = arith.cmpi slt, %22, %23 : vector<1x8x8xi32>
      %cst_16 = arith.constant -1.000000e+06 : f32
      %25 = vector.broadcast %cst_16 : f32 to vector<1x8x8xf32>
      %26 = arith.select %24, %17, %25 : vector<1x8x8xi1>, vector<1x8x8xf32>
      %c0_17 = arith.constant 0 : index
      %c0_18 = arith.constant 0 : index
      %c0_19 = arith.constant 0 : index
      %27 = vector.load %arg9[%c0_17, %c0_18, %c0_19] : memref<1x8x1xf32, #tpu.memory_space<vmem>>, vector<1x8x1xf32>
      %cst_20 = arith.constant dense<0xFF800000> : vector<1x8xf32>
      %28 = vector.multi_reduction <maximumf>, %26, %cst_20 [2] : vector<1x8x8xf32> to vector<1x8xf32>
      %29 = vector.shape_cast %28 : vector<1x8xf32> to vector<1x8x1xf32>
      %30 = arith.maximumf %27, %29 : vector<1x8x1xf32>
      %31 = arith.subf %27, %30 : vector<1x8x1xf32>
      %32 = math.exp %31 : vector<1x8x1xf32>
      %33 = vector.broadcast %30 : vector<1x8x1xf32> to vector<1x8x8xf32>
      %34 = arith.subf %26, %33 : vector<1x8x8xf32>
      %35 = math.exp %34 : vector<1x8x8xf32>
      %c0_21 = arith.constant 0 : index
      %c0_22 = arith.constant 0 : index
      %c0_23 = arith.constant 0 : index
      %36 = vector.load %arg10[%c0_21, %c0_22, %c0_23] : memref<1x8x1xf32, #tpu.memory_space<vmem>>, vector<1x8x1xf32>
      %37 = arith.mulf %32, %36 : vector<1x8x1xf32>
      %cst_24 = arith.constant dense<0.000000e+00> : vector<1x8xf32>
      %38 = vector.multi_reduction <add>, %35, %cst_24 [2] : vector<1x8x8xf32> to vector<1x8xf32>
      %39 = vector.shape_cast %38 : vector<1x8xf32> to vector<1x8x1xf32>
      %40 = arith.addf %37, %39 : vector<1x8x1xf32>
      %c0_25 = arith.constant 0 : index
      %c0_26 = arith.constant 0 : index
      %c0_27 = arith.constant 0 : index
      %41 = vector.load %arg10[%c0_25, %c0_26, %c0_27] : memref<1x8x1xf32, #tpu.memory_space<vmem>>, vector<1x8x1xf32>
      tpu.vector_store %arg10[%c0_25, %c0_26, %c0_27], %40 {strides = array<i32>} : memref<1x8x1xf32, #tpu.memory_space<vmem>>, vector<1x8x1xf32>,
      %c0_28 = arith.constant 0 : index
      %c0_29 = arith.constant 0 : index
      %c0_30 = arith.constant 0 : index
      %42 = vector.load %arg11[%c0_28, %c0_29, %c0_30] : memref<1x8x32xf32, #tpu.memory_space<vmem>>, vector<1x8x32xf32>
      %43 = vector.broadcast %32 : vector<1x8x1xf32> to vector<1x8x32xf32>
      %44 = arith.mulf %43, %42 : vector<1x8x32xf32>
      "tpu.trace_start"() <{level = 10 : i32, message = "bqk,bkd->bqd"}> : () -> ()
      %cst_31 = arith.constant dense<0.000000e+00> : vector<1x8x32xf32>
      %45 = tpu.matmul %35, %16, %cst_31 {dimension_numbers = #tpu.dot_dimension_numbers<[2], [1], [1], [2], [0, 0, 0, 1, 1, 2], [0], [0]>} : vector<1x8x8xf32>, vector<1x8x32xf32>, vector<1x8x32xf32> -> vector<1x8x32xf32>
      "tpu.trace_stop"() : () -> ()
      %46 = arith.addf %44, %45 : vector<1x8x32xf32>
      %c0_32 = arith.constant 0 : index
      %c0_33 = arith.constant 0 : index
      %c0_34 = arith.constant 0 : index
      %47 = vector.load %arg11[%c0_32, %c0_33, %c0_34] : memref<1x8x32xf32, #tpu.memory_space<vmem>>, vector<1x8x32xf32>
      tpu.vector_store %arg11[%c0_32, %c0_33, %c0_34], %46 {strides = array<i32>} : memref<1x8x32xf32, #tpu.memory_space<vmem>>, vector<1x8x32xf32>,
      %c0_35 = arith.constant 0 : index
      %c0_36 = arith.constant 0 : index
      %c0_37 = arith.constant 0 : index
      %48 = vector.load %arg9[%c0_35, %c0_36, %c0_37] : memref<1x8x1xf32, #tpu.memory_space<vmem>>, vector<1x8x1xf32>
      tpu.vector_store %arg9[%c0_35, %c0_36, %c0_37], %30 {strides = array<i32>} : memref<1x8x1xf32, #tpu.memory_space<vmem>>, vector<1x8x1xf32>,
    } else {
    }
    %c1_i32 = arith.constant 1 : i32
    %9 = arith.cmpi eq, %arg2, %c1_i32 : i32
    %10 = arith.extui %9 : i1 to i32
    %c0_i32_2 = arith.constant 0 : i32
    %11 = arith.cmpi ne, %10, %c0_i32_2 : i32
    scf.if %11 {
      %c0 = arith.constant 0 : index
      %c0_3 = arith.constant 0 : index
      %c0_4 = arith.constant 0 : index
      %12 = vector.load %arg10[%c0, %c0_3, %c0_4] : memref<1x8x1xf32, #tpu.memory_space<vmem>>, vector<1x8x1xf32>
      %cst = arith.constant 1.000000e+00 : f32
      %13 = vector.broadcast %cst : f32 to vector<1x8x1xf32>
      %14 = arith.divf %13, %12 : vector<1x8x1xf32>
      %c0_5 = arith.constant 0 : index
      %c0_6 = arith.constant 0 : index
      %c0_7 = arith.constant 0 : index
      %15 = vector.load %arg11[%c0_5, %c0_6, %c0_7] : memref<1x8x32xf32, #tpu.memory_space<vmem>>, vector<1x8x32xf32>
      %16 = vector.broadcast %14 : vector<1x8x1xf32> to vector<1x8x32xf32>
      %17 = arith.mulf %15, %16 : vector<1x8x32xf32>
      %c0_8 = arith.constant 0 : index
      %c0_9 = arith.constant 0 : index
      %c0_10 = arith.constant 0 : index
      %18 = vector.load %arg8[%c0_8, %c0_9, %c0_10] : memref<1x8x32xf32, #tpu.memory_space<vmem>>, vector<1x8x32xf32>
      tpu.vector_store %arg8[%c0_8, %c0_9, %c0_10], %17 {strides = array<i32>} : memref<1x8x32xf32, #tpu.memory_space<vmem>>, vector<1x8x32xf32>,
    } else {
    }
    return
  }
  func.func @transform_0(%arg0: i32, %arg1: i32, %arg2: i32, %arg3: memref<2xi32, #tpu.memory_space<smem>>) -> (i32, i32, i32) {
    %c0_i32 = arith.constant 0 : i32
    %c0_i32_0 = arith.constant 0 : i32
    return %arg0, %arg1, %c0_i32 : i32, i32, i32
  }
  func.func @transform_1(%arg0: i32, %arg1: i32, %arg2: i32, %arg3: memref<2xi32, #tpu.memory_space<smem>>) -> (i32, i32, i32) {
    %c0_i32 = arith.constant 0 : i32
    %c0_i32_0 = arith.constant 0 : i32
    return %arg0, %arg1, %c0_i32 : i32, i32, i32
  }
  func.func @transform_2(%arg0: i32, %arg1: i32, %arg2: i32, %arg3: memref<2xi32, #tpu.memory_space<smem>>) -> (i32, i32, i32) {
    %c0_i32 = arith.constant 0 : i32
    %c0_i32_0 = arith.constant 0 : i32
    return %arg0, %arg2, %c0_i32 : i32, i32, i32
  }
  func.func @transform_3(%arg0: i32, %arg1: i32, %arg2: i32, %arg3: memref<2xi32, #tpu.memory_space<smem>>) -> (i32, i32, i32) {
    %c0_i32 = arith.constant 0 : i32
    %c0_i32_0 = arith.constant 0 : i32
    return %arg0, %arg2, %c0_i32 : i32, i32, i32
  }
  func.func @transform_4(%arg0: i32, %arg1: i32, %arg2: i32, %arg3: memref<2xi32, #tpu.memory_space<smem>>) -> (i32, i32, i32) {
    %c0_i32 = arith.constant 0 : i32
    %c0_i32_0 = arith.constant 0 : i32
    return %arg0, %arg1, %c0_i32 : i32, i32, i32
  }
}

</mosaic_0001>

<bundles_post_ra>
// kernel: tpu_custom_call.1
= control target key start
LH: loop header
LB: loop body
LE: loop exit
PB: predicated region body
PF: predicated region fallthrough
CT: control target
= control target key end

     0   :  { %s1376_s0 = inlined_call_operand.vmem [shape: s32[2], index: 0, kind: input, shape index: {}]   ;;  %s1377_s1 = inlined_call_operand.vmem [shape: s32[2,8,1], index: 1, kind: input, shape index: {}]   ;;  %s1378_s2 = inlined_call_operand.vmem [shape: f32[2,8,32], index: 2, kind: input, shape index: {}]   ;;  %s1379_s3 = inlined_call_operand.hbm [shape: f32[2,16,32], index: 3, kind: input, shape index: {}]   ;;  %s1380_s4 = inlined_call_operand.hbm [shape: f32[2,16,32], index: 4, kind: input, shape index: {}]   ;;  %s1381_s5 = inlined_call_operand.hbm [shape: f32[2,8,32], index: 5, kind: output, shape index: {}]  }
   0x1   :  { %1386 = sst [smem:[#allocation22_spill]] %s1379_s3  ;;  %s10_s20 = sshll.u32 %s1376_s0, 4  ;;  %s11_s20 = int_to_ptr.vmem [resolvable:$true] %s10_s20 }
   0x2   :  { %s893_s21 = scalar_lea.vmem %s11_s20, 16  ;;  %p898_p1 = scmp.lt.s32.totalorder %s11_s20, %s11_s20 }
   0x3   :  { %p894_p0 = scmp.ne.s32.totalorder %s11_s20, %s893_s21  ;;  %p899_p2 = scmp.lt.s32.totalorder %s893_s21, %s893_s21 }
   0x5   :  { %p900_p3 = por %p899_p2, %p898_p1 }
   0x7   :  { %p901_p4 = pnand %p900_p3, %p894_p0 }
   0x9   :  { %904 = shalt.err (!%p901_p4)  }
   0xa   :  { %s1089_s22 = smov [#allocation6]  }
   0xb   :  { %13 = dma.vmem_to_smem %s11_s20, 16, %s1089_s22, [#allocation5] }
   0xc   :  { %1031 = dma.done.wait [#allocation5], 16 }
   0xd   :  { %1032 = vsyncadd [#allocation5], 4294967280 }
   0xe   :  { %15 = sfence }
   0xf   :  { %16 = vsyncpa [#allocation8], 0 }
  0x10   :  { %18 = vsyncpa [#allocation8 + $0x1], 0 }
  0x11   :  { %19 = vsyncpa [#allocation11], 0 }
  0x12   :  { %21 = vsyncpa [#allocation11 + $0x1], 0 }
  0x13   :  { %22 = vsyncpa [#allocation9], 0 }
  0x14   :  { %24 = vsyncpa [#allocation9 + $0x1], 0  ;;  %s1132_s0 = smov 0   ;;  %s1134_s23 = smov 0  }
  0x15   :  { %s1136_s24 = smov 0   ;;  %s1138_s25 = smov 0  }
  0x16   :  { %s1140_s26 = smov 0   ;;  %s1142_s27 = smov 0  }
  0x17   :  { %s1144_s28 = smov 0   ;;  %s1146_s29 = smov 0  }
  0x18   :  { %s1148_s30 = smov 0   ;;  %s1150_s6 = smov 0  }
  0x19   :  { %s1152_s7 = smov 0  }
  0x1a LB: > { %1387 = sst [smem:[#allocation17_spill]] %s1079_s30  ;;  %s729_s8 = sadd.s32 4294967295, %s1087_s7   ;;  %s1087_s7 = sphi %s1152_s7, %s30_s7   ;;  %s1083_s6 = sphi %s1150_s6, %s1403_s6   ;;  %s1079_s30 = sphi %s1148_s30, %s1402_s30   ;;  %s1075_s29 = sphi %s1146_s29, %s1401_s29   ;;  %s1071_s28 = sphi %s1144_s28, %s1400_s28   ;;  %s1067_s27 = sphi %s1142_s27, %s1409_s27   ;;  %s1063_s26 = sphi %s1140_s26, %s1408_s26   ;;  %s1059_s25 = sphi %s1138_s25, %s1407_s25   ;;  %s1055_s24 = sphi %s1136_s24, %s1406_s24   ;;  %s1051_s23 = sphi %s1134_s23, %s1405_s23   ;;  %s1047_s0 = sphi %s1132_s0, %s1404_s0  }
  0x1b   : > { %1388 = sst [smem:[#allocation18_spill]] %s1083_s6  ;;  %s730_s9 = sadd.s32 4294967294, %s1087_s7  }
  0x1c   : > { %s42_s10 = sadd.s32 1, %s1079_s30  ;;  %s49_s11 = sadd.s32 1, %s1083_s6 }
  0x1d   : > { %p43_p5 = scmp.ge.s32.totalorder %s42_s10, 2  ;;  %s114_s12 = sadd.s32 1, %s1067_s27 }
  0x1e   : > { %p121_p6 = scmp.ne.s32.totalorder %s1067_s27, %s1063_s26  ;;  %p122_p7 = scmp.eq.s32.totalorder %s1087_s7, 0 }
  0x1f   : > { %s1411_s10 = smov (%p43_p5, %s42_s10), 0  ;;  %s1413_s11 = smov (!%p43_p5, %s49_s11), %s1083_s6 }
  0x20   : > { %1389 = sst [smem:[#allocation19_spill]] %s1411_s10  ;;  %s110_s13 = ssub.s32 %s1079_s30, %s1411_s10 }
  0x21   : > { %p1198_p8 = por %p122_p7, %p121_p6  ;;  %p51_p9 = scmp.ge.s32.totalorder %s1413_s11, 2 }
  0x22   : > { %p127_p10 = scmp.ne.s32.totalorder %s1063_s26, %s1059_s25  ;;  %p128_p11 = scmp.eq.s32.totalorder %s729_s8, 0 }
  0x23   : > { %s170_s15 = sadd.s32 1, %s1055_s24  ;;  %s1415_s11 = smov (%p51_p9, %s1413_s11), 0 }
  0x24   : > { %1391 = sst [smem:[#allocation20_spill]] %s1415_s11  ;;  %p1206_p12 = por %p128_p11, %p127_p10 }
  0x25   : > { %p180_p13 = scmp.ne.s32.totalorder %s1055_s24, %s1051_s23  ;;  %s109_s17 = ssub.s32 %s1083_s6, %s1415_s11 }
  0x26   : > { %p181_p0 = scmp.eq.s32.totalorder %s729_s8, 3  ;;  %s111_s18 = sor.u32 %s110_s13, %s109_s17 }
  0x27   : > { %p168_p1 = scmp.eq.s32.totalorder %s109_s17, 0  ;;  %p112_p2 = scmp.eq.s32.totalorder %s111_s18, 0 }
  0x28   : > { %p1214_p3 = por %p181_p0, %p180_p13  ;;  %p186_p4 = scmp.ne.s32.totalorder %s1051_s23, %s1047_s0 }
  0x29   : > { %s1219_s20 = scalar_select %p168_p1, %s1055_s24, %s170_s15  }
  0x2a   : > { %s1222_s21 = scalar_select %p112_p2, %s1067_s27, %s114_s12  }
  0x2b   : > { %p187_p5 = scmp.eq.s32.totalorder %s730_s9, 3  ;;  %p787_p6 = scmp.lt.s32.totalorder %s1087_s7, 4 }
  0x2c   : > { %1394 = sst [smem:[#allocation21_spill]] %s1222_s21  ;;  %s1232_s25 = sand.u32 1, %s1067_s27  }
  0x2d   : > { %p1227_p7 = por %p187_p5, %p186_p4  ;;  %s733_s8 = sshll.u32 %s1232_s25, 3 }
  0x2e   : > { %s734_s13 = sshll.u32 %s1083_s6, 1  ;;  %s231_s17 = scalar_lea.vmem [#allocation7], %s733_s8 }
  0x2f   : > { %s236_s15 = sadd.s32 %s1079_s30, %s734_s13  ;;  %s240_s12 = sshll.u32 %s231_s17, 4  ;;  %s241_s12 = int_to_ptr.vmem [resolvable:$true] %s240_s12 }
  0x30   : > { %s735_s18 = sshll.u32 %s236_s15, 7  ;;  %s1396_s3 = sld [smem:[#allocation22_spill]] }
  0x31   : > { %p1244_p9 = pnand %p787_p6, %p1198_p8  ;;  %p739_p10 = scmp.ge.s32.totalorder %s1087_s7, 1 }
  0x32   : > { %p265_p11 = scmp.lt.s32.totalorder %s1087_s7, 5  ;;  %s228_s6 = scalar_lea.sflag [#allocation8], %s1232_s25 }
  0x33   : > { %p907_p13 = pneg %p1244_p9  ;;  %s918_s13 = scalar_lea.vmem %s241_s12, 128 }
  0x34   : > { %p919_p0 = scmp.ne.s32.totalorder %s241_s12, %s918_s13  ;;  %s1090_s11 = smov [#allocation7]  }
  0x35   : > { %s923_s15 = sshll.u32 %s1090_s11, 4  ;;  %s924_s15 = int_to_ptr.vmem [resolvable:$false] %s923_s15 }
  0x36   : > { %s238_s10 = scalar_lea.hbm %s1396_s3, %s735_s18  ;;  %p921_p1 = pnand %p919_p0, %p907_p13 }
  0x37   : > { %s925_s14 = scalar_lea.vmem %s924_s15, 256  ;;  %p926_p8 = scmp.lt.s32.totalorder %s241_s12, %s924_s15 }
  0x38   : > { %p922_p2 = pneg %p921_p1  ;;  %p927_p4 = scmp.lt.s32.totalorder %s925_s14, %s918_s13 }
  0x3a   : > { %p928_p5 = por %p927_p4, %p926_p8 }
  0x3c   : > { %p929_p6 = pnand %p928_p5, %p922_p2 }
  0x3e   : > { %932 = shalt.err (!%p929_p6)
}
  0x3f   : > { %779 = dma.hbm_to_vmem [thread:$0]  (!%p1244_p9), %s238_s10, 128, %s241_s12, %s228_s6  }
  0x40   : > { %p1262_p0 = pnand %p739_p10, %p265_p11  ;;  %s258_s13 = scalar_lea.hbm %s1380_s4, %s735_s18 }
  0x41   : > { %s251_s15 = scalar_lea.vmem [#allocation10], %s733_s8  ;;  %s248_s3 = scalar_lea.sflag [#allocation11], %s1232_s25 }
  0x42   : > { %s260_s14 = sshll.u32 %s251_s15, 4  ;;  %s1091_s6 = smov [#allocation10]   ;;  %s261_s14 = int_to_ptr.vmem [resolvable:$true] %s260_s14 }
  0x43   : > { %s946_s30 = scalar_lea.vmem %s261_s14, 128  ;;  %s951_s10 = sshll.u32 %s1091_s6, 4  ;;  %s952_s10 = int_to_ptr.vmem [resolvable:$false] %s951_s10 }
  0x44   : > { %p947_p1 = scmp.ne.s32.totalorder %s261_s14, %s946_s30  ;;  %s953_s12 = scalar_lea.vmem %s952_s10, 256 }
  0x45   : > { %p954_p10 = scmp.lt.s32.totalorder %s261_s14, %s952_s10  ;;  %p955_p11 = scmp.lt.s32.totalorder %s953_s12, %s946_s30 }
  0x46   : > { %p949_p2 = pnand %p947_p1, %p907_p13 }
  0x47   : > { %p956_p4 = por %p955_p11, %p954_p10 }
  0x48   : > { %p950_p8 = pneg %p949_p2 }
  0x4a   : > { %p957_p5 = pnand %p956_p4, %p950_p8 }
  0x4c   : > { %960 = shalt.err (!%p957_p5)
}
  0x4d   : > { %782 = dma.hbm_to_vmem [thread:$0]  (!%p1244_p9), %s258_s13, 128, %s261_s14, %s248_s3  }
  0x4e   : > { %269 = sbr.rel (%p1262_p0) target bundleno = 960 (0x3c0), region = 36  ;;  %s271_s25 = sand.u32 (!%p1262_p0), 1, %s1063_s26  }
  0x4f   : > { %s740_s8 = sshll.u32 (!%p1262_p0), %s271_s25, 3  ;;  %s272_s18 = scalar_lea.sflag (!%p1262_p0), [#allocation8], %s271_s25 }
  0x50   : > { %s275_s9 = scalar_lea.vmem (!%p1262_p0), [#allocation7], %s740_s8 }
  0x53   : > { %1034 = dma.done.wait (%p1206_p12), %s272_s18, 128  }
  0x54   : > { %1036 = vsyncadd (%p1206_p12), %s272_s18, 4294967168  ;;  %s281_s30 = scalar_lea.sflag [#allocation11], %s271_s25  ;;  %s1284_s11 = scalar_lea.vmem [#allocation10], %s740_s8 }
  0x55   : > { %1038 = dma.done.wait (%p1206_p12), %s281_s30, 128  }
  0x56   : > { %1040 = vsyncadd (%p1206_p12), %s281_s30, 4294967168  ;;  %s325_s3 = sand.u32 1, %s1051_s23   ;;  %p328_p9 = scmp.lt.s32.totalorder %s1075_s29, 1 }
  0x57   : > { %s1294_s21 = sshll.u32 %s325_s3, 3  ;;  %p745_p12 = scmp.ne.s32.totalorder %s1071_s28, 0 }
  0x58   : > { %s329_s17 = scalar_select %p328_p9, %s1075_s29, 1 }
  0x59   : > { %s327_s25 = scalar_lea.vmem [#allocation12], %s1294_s21  ;;  %345 = sbr.rel (%p745_p12) target bundleno = 97 (0x61), region = 48 }
  0x5a   : > { %s743_s13 = sshll.u32 %s329_s17, 3 }
  0x5b   : > { %s334_s6 = scalar_lea.vmem %s1377_s1, %s743_s13  ;;  %s341_s16 = scalar_lea.vmem %s1378_s2, %s743_s13 }
  0x5e   : > { %vm346_vm0 = vcmask 7168   ;;  %vm349_vm1 = vcmask 261120   ;;  %v1092_v0 = vmov -inf   ;;  %v1093_v1 = vmov 0.0  }
  0x5f   : > { %347 = vst.msk [vmem:[#allocation2] sm:$0xff] %vm346_vm0, %v1092_v0  ;;  %348 = vst.msk [vmem:[#allocation3] sm:$0xff] %vm346_vm0, %v1093_v1 }
  0x60   : > { %350 = vst.msk [vmem:[#allocation4] sm:$0xff] %vm349_vm1, %v1093_v1 }
  0x61 PF: > { %s351_s8 = sld [smem:[#allocation6 + %s1075_s29]]  ;;  %s746_s18 = sshll.u32 %s1071_s28, 3 }
  0x67   : > { %p747_p13 = scmp.ge.s32.totalorder %s746_s18, %s351_s8 }
  0x69   : > { %356 = sbr.rel (%p747_p13) target bundleno = 788 (0x314), region = 52 }
  0x6e   : > { %v359_v2 = vld [vmem:[%s275_s9] sm:$0xff]  ;;  %vm361_vm2 = vcmask 261120   ;;  %v1094_v4 = vmov 0.0   ;;  %vm1095_vm3 = vmmov 0   ;;  %v439_v7 = vstv %s746_s18  ;;  %v360_v21 = vld [vmem:[%s1284_s11] sm:$0xff] }
  0x6f   : > { %v357_v3 = vld [vmem:[%s341_s16] sm:$0xff]  ;;  %760 = vmatprep.subr.mxu0 %v1094_v4  ;;  %762 = vmatprep.mubr.msk.f32.mxu0 %vm1095_vm3, %v1094_v4  ;;  %v1096_v8 = vmov 0   ;;  %v441_v10 = vlaneseq  ;;  %vm449_vm5 = vcmask 64512   ;;  %vm471_vm6 = vcmask 7168   ;;  %v465_v29 = vld [vmem:[#allocation3] sm:$0xff]  ;;  %v473_v33 = vld [vmem:[#allocation4] sm:$0xff] }
  0x70   : > { %v358_v5 = vmul.f32 0.17677669, %v357_v3  ;;  %v438_v6 = vld [vmem:[%s334_s6] sm:$0xff]  ;;  %761 = vmatpush3.xpose.msk.msra.mxu0 %vm361_vm2, %v359_v2  ;;  %884 = vset.pattern.permute.xlu0 %v1096_v8 }
  0x71   : > { %v440_v9 = vsub.s32 %v438_v6, %v439_v7  ;;  %885 = vset.pattern.permute.xlu1 %v1096_v8  ;;  %765 = vmatprep.subr.mxu1 %v1094_v4  ;;  %v442_v11 = vand.u32 127, %v441_v10  ;;  %v448_v17 = vld [vmem:[#allocation2] sm:$0xff] }
  0x72   : > { %767 = vmatprep.mubr.msk.f32.mxu1 %vm1095_vm3, %v1094_v4  ;;  %766 = vmatpush3.msra.mxu1 %v360_v21 }
  0x73   : > { %444 = vperm.xlu0 %884, %v440_v9   ;;  %763 = vmatmul.mubr.msk.f32.vlgmr.msra.gmra.mxu0 %vm361_vm2, %v358_v5 }
  0xee   : > { %v445_v12 = vpop.permute.xlu0 %444 }
  0xef   : > { %vm446_vm4 = vcmp.lt.s32.totalorder %v442_v11, %v445_v12 }
 0x133   : > { %v434_v13 = vpop.f32.mrf.mxu0 }
 0x134   : > { %v447_v14 = vsel %vm446_vm4, %v434_v13, -1000000.0 }
 0x135   : > { %v764_v15 = vpop.f32.mrf.mxu0  ;;  %v450_v16 = vsel %vm449_vm5, %v447_v14, -inf }
 0x136   : > { %451 = vmax.xlane.f32.xlu0 %v450_v16 }
 0x1bf   : > { %v452_v18 = vpop.xlane.xlu0 %451 }
 0x1c0   : > { %v453_v19 = vmax.f32 %v448_v17, %v452_v18 }
 0x1c2   : > { %v454_v20 = vsub.f32 %v448_v17, %v453_v19  ;;  %555 = vst.msk [vmem:[#allocation2] sm:$0xff] %vm471_vm6, %v453_v19  ;;  %459 = vperm.xlu1 %885, %v453_v19  }
 0x1c4   : > { %v455_v22 = vmul.f32 1.442695, %v454_v20 }
 0x1c6   : > { %886 = vpow2.f32 %v455_v22 }
 0x1d3   : > { %v887_v23 = vpop.eup %886 }
 0x1d4   : > { %476 = vperm.xlu0 %884, %v887_v23   ;;  %v466_v30 = vmul.f32 %v887_v23, %v465_v29 }
 0x23d   : > { %v460_v24 = vpop.permute.xlu1 %459 }
 0x23e   : > { %v462_v25 = vsub.f32 %v447_v14, %v460_v24 }
 0x240   : > { %v463_v26 = vmul.f32 1.442695, %v462_v25 }
 0x242   : > { %888 = vpow2.f32 %v463_v26 }
 0x24f   : > { %v889_v27 = vpop.eup %888  ;;  %v477_v34 = vpop.permute.xlu0 %476 }
 0x250   : > { %768 = vmatmul.mubr.msk.f32.vlgmr.msra.gmra.mxu1 %vm449_vm5, %v889_v27  ;;  %v467_v28 = vsel %vm449_vm5, %v889_v27, 0.0  ;;  %v479_v35 = vmul.f32 %v477_v34, %v473_v33 }
 0x251   : > { %468 = vadd.xlane.f32.xlu1 %v467_v28 }
 0x2da   : > { %v469_v31 = vpop.xlane.xlu1 %468 }
 0x2db   : > { %v470_v32 = vadd.f32 %v469_v31, %v466_v30 }
 0x2dd   : > { %472 = vst.msk [vmem:[#allocation3] sm:$0xff] %vm471_vm6, %v470_v32 }
 0x310   : > { %v549_v36 = vpop.f32.mrf.mxu1 }
 0x311   : > { %v553_v37 = vadd.f32 %v549_v36, %v479_v35 }
 0x312   : > { %v769_v38 = vpop.f32.mrf.mxu1 }
 0x313   : > { %554 = vst.msk [vmem:[#allocation4] sm:$0xff] %vm361_vm2, %v553_v37 }
 0x314 PF: > { %p751_p6 = scmp.ne.s32.totalorder %s1071_s28, 1 }
 0x316   : > { %559 = sbr.rel (%p751_p6) target bundleno = 937 (0x3a9), region = 56 }
 0x31b   : > { %v560_v39 = vld [vmem:[#allocation3] sm:$0xff]  ;;  %v1097_v40 = vmov 0   ;;  %v563_v42 = vld [vmem:[#allocation4] sm:$0xff]  ;;  %vm570_vm7 = vcmask 261120  }
 0x31c   : > { %890 = vset.pattern.permute.xlu0 %v1097_v40  ;;  %891 = vrcp.f32 %v560_v39 }
 0x329   : > { %v892_v41 = vpop.eup %891 }
 0x32a   : > { %566 = vperm.xlu0 %890, %v892_v41  }
 0x3a5   : > { %v567_v43 = vpop.permute.xlu0 %566 }
 0x3a6   : > { %v569_v44 = vmul.f32 %v567_v43, %v563_v42 }
 0x3a8   : > { %571 = vst.msk [vmem:[%s327_s25] sm:$0xff] %vm570_vm7, %v569_v44 }
 0x3a9 PF: > { %s753_s28 = sshll.u32 %s1075_s29, 7  ;;  %s587_s17 = sshll.u32 %s327_s25, 4  ;;  %s588_s17 = int_to_ptr.vmem [resolvable:$true] %s587_s17 }
 0x3aa   : > { %s585_s11 = scalar_lea.hbm %s1381_s5, %s753_s28  ;;  %s573_s13 = scalar_lea.sflag [#allocation9], %s325_s3 }
 0x3ab   : > { %s961_s15 = scalar_lea.vmem %s588_s17, 128  ;;  %s1098_s14 = smov [#allocation12]  }
 0x3ac   : > { %p962_p0 = scmp.ne.s32.totalorder %s588_s17, %s961_s15  ;;  %s965_s6 = sshll.u32 %s1098_s14, 4  ;;  %s966_s6 = int_to_ptr.vmem [resolvable:$false] %s965_s6 }
 0x3ad   : > { %s967_s10 = scalar_lea.vmem %s966_s6, 256  ;;  %p968_p8 = scmp.lt.s32.totalorder %s588_s17, %s966_s6 }
 0x3ae   : > { %p963_p1 = pnand %p962_p0, %p1214_p3  ;;  %p969_p10 = scmp.lt.s32.totalorder %s967_s10, %s961_s15 }
 0x3b0   : > { %p964_p2 = pneg %p963_p1  ;;  %p970_p11 = por %p969_p10, %p968_p8 }
 0x3b2   : > { %p971_p4 = pnand %p970_p11, %p964_p2 }
 0x3b4   : > { %974 = shalt.err (!%p971_p4)
}
 0x3b5   : > { %s975_s29 = scalar_lea.hbm %s585_s11, 128  ;;  %s979_s12 = scalar_lea.hbm %s1381_s5, 256 }
 0x3b6   : > { %p976_p5 = scmp.ne.s32.totalorder %s585_s11, %s975_s29  ;;  %p980_p13 = scmp.lt.s32.totalorder %s585_s11, %s1381_s5 }
 0x3b7   : > { %p981_p6 = scmp.lt.s32.totalorder %s979_s12, %s975_s29 }
 0x3b8   : > { %p977_p9 = pnand %p976_p5, %p1214_p3 }
 0x3b9   : > { %p982_p0 = por %p981_p6, %p980_p13 }
 0x3ba   : > { %p978_p12 = pneg %p977_p9 }
 0x3bc   : > { %p983_p1 = pnand %p982_p0, %p978_p12 }
 0x3be   : > { %986 = shalt.err (!%p983_p1)
}
 0x3bf   : > { %774 = dma.vmem_to_hbm [thread:$0]  (%p1214_p3), %s588_s17, 128, %s585_s11, %s573_s13  }
 0x3c0 PF: > { %p788_p2 = scmp.ge.s32.totalorder %s1087_s7, 2  ;;  %s599_s8 = sand.u32 1, %s1047_s0  }
 0x3c1   : > { %s600_s18 = scalar_lea.sflag [#allocation9], %s599_s8 }
 0x3c2   : > { %p784_p8 = pnand %p788_p2, %p1227_p7 }
 0x3c4   : > { %p785_p10 = pneg %p784_p8 }
 0x3c6   : > { %1042 = dma.done.wait (%p785_p10), %s600_s18, 128  }
 0x3c7   : > { %1044 = vsyncadd (%p785_p10), %s600_s18, 4294967168  ;;  %s30_s7 = sadd.s32 1, %s1087_s7   ;;  %s1399_s19 = sld [smem:[#allocation21_spill]] }
 0x3c8   : > { %p27_p11 = scmp.ge.s32.totalorder %s30_s7, 6   ;;  %s1400_s28 = sld [smem:[#allocation17_spill]] }
 0x3c9   : > { %s1401_s29 = sld [smem:[#allocation18_spill]]  ;;  %s1404_s0 = smov %s1051_s23 }
 0x3ca   : > { %s1402_s30 = sld [smem:[#allocation19_spill]]  ;;  %s1405_s23 = smov %s1055_s24 }
 0x3cb   : > { %s1403_s6 = sld [smem:[#allocation20_spill]]  ;;  %s1406_s24 = smov %s1219_s20 }
 0x3cc   : > { %s1407_s25 = smov %s1063_s26  ;;  %s1408_s26 = smov %s1067_s27 }
 0x3cd   : > { %s1409_s27 = smov %s1399_s19  ;;  %29 = sbr.rel (!%p27_p11) target bundleno = 26 (0x1a), region = 112 }
 0x3d2   :  { %605 = vsyncpa [#allocation8], 1 }
 0x3d3   :  { %607 = vsyncpa [#allocation8 + $0x1], 1 }
 0x3d4   :  { %608 = vsyncpa [#allocation11], 1 }
 0x3d5   :  { %610 = vsyncpa [#allocation11 + $0x1], 1 }
 0x3d6   :  { %611 = vsyncpa [#allocation9], 1 }
 0x3d7   :  { %613 = vsyncpa [#allocation9 + $0x1], 1 }

</bundles_post_ra>
